<compile_context>
chip_gen: v7x
topology: tpu7x:2x2x1
jax: 0.10.0
libtpu: 0.0.40
codegen_flags: <defaults>
</compile_context>

<pallas_src>
import jax
import jax.numpy as jnp
from jax import lax
from jax.experimental import pallas as pl
from jax.experimental.pallas import tpu as pltpu

BN_EPS = 1e-5


def _shift_lanes(x, direction):
    """Shift a (C, L) activation by one step along the length (lane) axis.

    direction=+1: out[:, l] = x[:, l-1], column 0 zeroed   (k=0 tap)
    direction=-1: out[:, l] = x[:, l+1], column L-1 zeroed (k=2 tap)

    For lane-aligned L (multiple of 128) this is a cheap XLU rotation plus a
    boundary mask; otherwise (tiny test shapes) fall back to slice+concat,
    which all lives inside a single vreg anyway.
    """
    C, L = x.shape
    if L % 128 == 0:
        rolled = pltpu.roll(x, shift=direction, axis=1)
        col = lax.broadcasted_iota(jnp.int32, (C, L), 1)
        mask = (col > 0) if direction == 1 else (col < (L - 1))
        return jnp.where(mask, rolled, jnp.zeros_like(rolled))
    zeros = jnp.zeros((C, 1), x.dtype)
    if direction == 1:
        return jnp.concatenate([zeros, x[:, : L - 1]], axis=1)
    return jnp.concatenate([x[:, 1:], zeros], axis=1)


def _conv1d_k3_fused(x, w_fused):
    """k=3, pad=1 conv as a single MXU matmul.

    x:        (Cin, L)  float32 channel-major activation
    w_fused:  (Cout, 3*Cin) tap-major columns [k=0 | k=1 | k=2]
    returns:  (Cout, L) float32
    """
    x_prev = _shift_lanes(x, +1)                          # x[:, l-1]
    x_next = _shift_lanes(x, -1)                          # x[:, l+1]
    xs = jnp.concatenate([x_prev, x, x_next], axis=0)     # (3*Cin, L)
    return jnp.dot(w_fused, xs, preferred_element_type=jnp.float32)


def cnn1_kernel(x_ref,
                w1_ref, s1_ref, t1_ref,
                w2_ref, s2_ref, t2_ref,
                w3_ref, b3_ref,
                o_ref):
    # Load weights / folded BN params once per grid step.
    w1 = w1_ref[...]
    s1 = s1_ref[...]
    t1 = t1_ref[...]
    w2 = w2_ref[...]
    s2 = s2_ref[...]
    t2 = t2_ref[...]
    w3 = w3_ref[...]
    b3 = b3_ref[...]

    tb = x_ref.shape[0]
    for b in range(tb):                                   # small static unroll
        x = x_ref[b].astype(jnp.float32)                  # (Cin, L)

        # block 1: conv (bias folded into t1) + BN scale/shift + ReLU
        y = _conv1d_k3_fused(x, w1)                       # (H, L)
        y = jnp.maximum(y * s1 + t1, 0.0)

        # block 2
        y = _conv1d_k3_fused(y, w2)                       # (64, L)
        y = jnp.maximum(y * s2 + t2, 0.0)

        # block 3: final conv + bias
        y = _conv1d_k3_fused(y, w3) + b3                  # (Cout, L)

        o_ref[b] = y.astype(o_ref.dtype)                  # NCL store, lane = L


def _largest_divisor_leq(n, cap):
    for t in range(min(n, cap), 0, -1):
        if n % t == 0:
            return t
    return 1


def cnn1_forward(x_ncl, kparams, *, batch_tile_cap=8):
    """x_ncl: (B, Cin, L) like PyTorch Conv1d input. Returns (B, Cout, L)."""
    (w1f, s1, t1, w2f, s2, t2, w3f, b3) = kparams
    B, Cin, L = x_ncl.shape
    H = w1f.shape[0]
    Cmid = w2f.shape[0]
    Cout = w3f.shape[0]

    tb = _largest_divisor_leq(B, batch_tile_cap)          # batch elems / step
    nb = B // tb

    full = lambda a: pl.BlockSpec(a.shape, lambda i: (0,) * a.ndim)

    flops = 2 * B * L * (3 * Cin * H + 3 * H * Cmid + 3 * Cmid * Cout)
    bytes_accessed = 4 * (
        B * Cin * L + B * Cout * L
        + w1f.size + w2f.size + w3f.size
        + s1.size + t1.size + s2.size + t2.size + b3.size)

    return pl.pallas_call(
        cnn1_kernel,
        out_shape=jax.ShapeDtypeStruct((B, Cout, L), x_ncl.dtype),
        grid_spec=pltpu.PrefetchScalarGridSpec(
            num_scalar_prefetch=0,
            grid=(nb,),
            in_specs=[
                pl.BlockSpec((tb, Cin, L), lambda i: (i, 0, 0)),
                full(w1f), full(s1), full(t1),
                full(w2f), full(s2), full(t2),
                full(w3f), full(b3),
            ],
            out_specs=pl.BlockSpec((tb, Cout, L), lambda i: (i, 0, 0)),
        ),
        compiler_params=pltpu.CompilerParams(
            dimension_semantics=("parallel",),
            vmem_limit_bytes=32 * 1024 * 1024,
        ),
        cost_estimate=pl.CostEstimate(
            flops=flops, transcendentals=0, bytes_accessed=bytes_accessed),
    )(x_ncl, w1f, s1, t1, w2f, s2, t2, w3f, b3)


def make_raw_params(key, cin, hidden, cout):
    """PyTorch-layout parameters: conv weight (Cout, Cin, 3), bias (Cout,),
    BatchNorm (gamma, beta, running_mean, running_var)."""
    ks = jax.random.split(key, 16)

    def conv(kw, kb, ci, co):
        scale = 1.0 / jnp.sqrt(jnp.float32(ci * 3))
        w = jax.random.normal(kw, (co, ci, 3), jnp.float32) * scale
        b = jax.random.normal(kb, (co,), jnp.float32) * 0.05
        return w, b

    def bn(kg, kb, km, kv, c):
        gamma = 1.0 + 0.1 * jax.random.normal(kg, (c,), jnp.float32)
        beta = 0.1 * jax.random.normal(kb, (c,), jnp.float32)
        mean = 0.1 * jax.random.normal(km, (c,), jnp.float32)
        var = 1.0 + 0.1 * jnp.abs(jax.random.normal(kv, (c,), jnp.float32))
        return gamma, beta, mean, var

    w1, b1 = conv(ks[0], ks[1], cin, hidden)
    bn1 = bn(ks[2], ks[3], ks[4], ks[5], hidden)
    w2, b2 = conv(ks[6], ks[7], hidden, 64)
    bn2 = bn(ks[8], ks[9], ks[10], ks[11], 64)
    w3, b3 = conv(ks[12], ks[13], 64, cout)
    return (w1, b1, bn1, w2, b2, bn2, w3, b3)


def fold_params(raw):
    """Raw PyTorch-layout params -> kernel params:
    fused conv weights (Cout, 3*Cin) tap-major, BN folded to per-channel
    scale/shift column vectors with the conv bias folded into the shift."""
    (w1, b1, bn1, w2, b2, bn2, w3, b3) = raw

    def fuse_w(w):                       # (Cout, Cin, 3) -> (Cout, 3*Cin)
        co, ci, k = w.shape
        return jnp.transpose(w, (0, 2, 1)).reshape(co, k * ci)

    def fold_bn(bn_p, bias):
        gamma, beta, mean, var = bn_p
        s = gamma / jnp.sqrt(var + BN_EPS)
        t = (bias - mean) * s + beta
        return s[:, None], t[:, None]    # (C, 1) column vectors

    s1, t1 = fold_bn(bn1, b1)
    s2, t2 = fold_bn(bn2, b2)
    return (fuse_w(w1), s1, t1, fuse_w(w2), s2, t2, fuse_w(w3), b3[:, None])


def cnn1_reference(x_ncl, raw):
    """Plain-JAX reference (lax.conv + eval-mode BN) to validate the kernel."""
    (w1, b1, bn1, w2, b2, bn2, w3, b3) = raw

    def conv(x, w, b):                   # w: (Cout, Cin, 3) == OIW
        y = lax.conv_general_dilated(
            x, w, window_strides=(1,), padding=((1, 1),),
            dimension_numbers=("NCH", "OIH", "NCH"))
        return y + b[None, :, None]

    def bnorm(x, bn_p):
        gamma, beta, mean, var = bn_p
        s = gamma / jnp.sqrt(var + BN_EPS)
        return (x - mean[None, :, None]) * s[None, :, None] + beta[None, :, None]

    y = jnp.maximum(bnorm(conv(x_ncl, w1, b1), bn1), 0.0)
    y = jnp.maximum(bnorm(conv(y, w2, b2), bn2), 0.0)
    return conv(y, w3, b3)


if __name__ == "__main__":
    B, Cin, H, Cout, L = 2, 4, 32, 4, 16
    key = jax.random.PRNGKey(0)
    kx, kp = jax.random.split(key)
    x = jax.random.normal(kx, (B, Cin, L), jnp.float32)   # NCL, like PyTorch
    raw = make_raw_params(kp, Cin, H, Cout)
    kparams = fold_params(raw)

    out = jax.block_until_ready(cnn1_forward(x, kparams))
    ref = jax.block_until_ready(cnn1_reference(x, raw))

    assert out.shape == (B, Cout, L), out.shape
    err = float(jnp.max(jnp.abs(out - ref)))
    assert err < 1e-4, err
    print("KERNEL_OK")
</pallas_src>

<mosaic_0001>
module attributes {stable_mosaic.version = 11 : i64} {
  func.func @cnn1_kernel(%arg0: i32, %arg1: memref<2x4x16xf32, #tpu.memory_space<vmem>>, %arg2: memref<32x12xf32, #tpu.memory_space<vmem>>, %arg3: memref<32x1xf32, #tpu.memory_space<vmem>>, %arg4: memref<32x1xf32, #tpu.memory_space<vmem>>, %arg5: memref<64x96xf32, #tpu.memory_space<vmem>>, %arg6: memref<64x1xf32, #tpu.memory_space<vmem>>, %arg7: memref<64x1xf32, #tpu.memory_space<vmem>>, %arg8: memref<4x192xf32, #tpu.memory_space<vmem>>, %arg9: memref<4x1xf32, #tpu.memory_space<vmem>>, %arg10: memref<2x4x16xf32, #tpu.memory_space<vmem>>) attributes {dimension_semantics = [#tpu.dimension_semantics<parallel>], iteration_bounds = array<i64: 1>, scalar_prefetch = 0 : i64, scratch_operands = 0 : i64, tpu.core_type = #tpu.core_type<tc>, window_params = [{transform_indices = @transform_0, window_bounds = array<i64: 2, 4, 16>}, {pipeline_mode = #tpu.pipeline_mode<synchronous>, transform_indices = @transform_1, window_bounds = array<i64: 32, 12>}, {pipeline_mode = #tpu.pipeline_mode<synchronous>, transform_indices = @transform_2, window_bounds = array<i64: 32, 1>}, {pipeline_mode = #tpu.pipeline_mode<synchronous>, transform_indices = @transform_3, window_bounds = array<i64: 32, 1>}, {pipeline_mode = #tpu.pipeline_mode<synchronous>, transform_indices = @transform_4, window_bounds = array<i64: 64, 96>}, {pipeline_mode = #tpu.pipeline_mode<synchronous>, transform_indices = @transform_5, window_bounds = array<i64: 64, 1>}, {pipeline_mode = #tpu.pipeline_mode<synchronous>, transform_indices = @transform_6, window_bounds = array<i64: 64, 1>}, {pipeline_mode = #tpu.pipeline_mode<synchronous>, transform_indices = @transform_7, window_bounds = array<i64: 4, 192>}, {pipeline_mode = #tpu.pipeline_mode<synchronous>, transform_indices = @transform_8, window_bounds = array<i64: 4, 1>}, {transform_indices = @transform_9, window_bounds = array<i64: 2, 4, 16>}]} {
    %c0 = arith.constant 0 : index
    %c0_0 = arith.constant 0 : index
    %0 = vector.load %arg2[%c0, %c0_0] : memref<32x12xf32, #tpu.memory_space<vmem>>, vector<32x12xf32>
    %c0_1 = arith.constant 0 : index
    %c0_2 = arith.constant 0 : index
    %1 = vector.load %arg3[%c0_1, %c0_2] : memref<32x1xf32, #tpu.memory_space<vmem>>, vector<32x1xf32>
    %c0_3 = arith.constant 0 : index
    %c0_4 = arith.constant 0 : index
    %2 = vector.load %arg4[%c0_3, %c0_4] : memref<32x1xf32, #tpu.memory_space<vmem>>, vector<32x1xf32>
    %c0_5 = arith.constant 0 : index
    %c0_6 = arith.constant 0 : index
    %3 = vector.load %arg5[%c0_5, %c0_6] : memref<64x96xf32, #tpu.memory_space<vmem>>, vector<64x96xf32>
    %c0_7 = arith.constant 0 : index
    %c0_8 = arith.constant 0 : index
    %4 = vector.load %arg6[%c0_7, %c0_8] : memref<64x1xf32, #tpu.memory_space<vmem>>, vector<64x1xf32>
    %c0_9 = arith.constant 0 : index
    %c0_10 = arith.constant 0 : index
    %5 = vector.load %arg7[%c0_9, %c0_10] : memref<64x1xf32, #tpu.memory_space<vmem>>, vector<64x1xf32>
    %c0_11 = arith.constant 0 : index
    %c0_12 = arith.constant 0 : index
    %6 = vector.load %arg8[%c0_11, %c0_12] : memref<4x192xf32, #tpu.memory_space<vmem>>, vector<4x192xf32>
    %c0_13 = arith.constant 0 : index
    %c0_14 = arith.constant 0 : index
    %7 = vector.load %arg9[%c0_13, %c0_14] : memref<4x1xf32, #tpu.memory_space<vmem>>, vector<4x1xf32>
    %c0_15 = arith.constant 0 : index
    %c0_16 = arith.constant 0 : index
    %c0_17 = arith.constant 0 : index
    %8 = vector.load %arg1[%c0_15, %c0_16, %c0_17] : memref<2x4x16xf32, #tpu.memory_space<vmem>>, vector<1x4x16xf32>
    %9 = vector.shape_cast %8 : vector<1x4x16xf32> to vector<4x16xf32>
    %cst = arith.constant 0.000000e+00 : f32
    %10 = vector.broadcast %cst : f32 to vector<4x1xf32>
    %11 = vector.extract_strided_slice %9 {offsets = [0, 0], sizes = [4, 15], strides = [1, 1]} : vector<4x16xf32> to vector<4x15xf32>
    %12 = tpu.concatenate %10, %11 in 1 : vector<4x1xf32>, vector<4x15xf32> -> vector<4x16xf32>
    %cst_18 = arith.constant 0.000000e+00 : f32
    %13 = vector.broadcast %cst_18 : f32 to vector<4x1xf32>
    %14 = vector.extract_strided_slice %9 {offsets = [0, 1], sizes = [4, 15], strides = [1, 1]} : vector<4x16xf32> to vector<4x15xf32>
    %15 = tpu.concatenate %14, %13 in 1 : vector<4x15xf32>, vector<4x1xf32> -> vector<4x16xf32>
    %16 = tpu.concatenate %12, %9, %15 in 0 : vector<4x16xf32>, vector<4x16xf32>, vector<4x16xf32> -> vector<12x16xf32>
    %cst_19 = arith.constant dense<0.000000e+00> : vector<32x16xf32>
    %17 = tpu.matmul %0, %16, %cst_19 {dimension_numbers = #tpu.dot_dimension_numbers<[1], [0], [0], [1], [0, 0, 1, 1], [], []>} : vector<32x12xf32>, vector<12x16xf32>, vector<32x16xf32> -> vector<32x16xf32>
    %18 = vector.broadcast %1 : vector<32x1xf32> to vector<32x16xf32>
    %19 = arith.mulf %17, %18 : vector<32x16xf32>
    %20 = vector.broadcast %2 : vector<32x1xf32> to vector<32x16xf32>
    %21 = arith.addf %19, %20 : vector<32x16xf32>
    %cst_20 = arith.constant 0.000000e+00 : f32
    %22 = vector.broadcast %cst_20 : f32 to vector<32x16xf32>
    %23 = arith.maximumf %21, %22 : vector<32x16xf32>
    %cst_21 = arith.constant 0.000000e+00 : f32
    %24 = vector.broadcast %cst_21 : f32 to vector<32x1xf32>
    %25 = vector.extract_strided_slice %23 {offsets = [0, 0], sizes = [32, 15], strides = [1, 1]} : vector<32x16xf32> to vector<32x15xf32>
    %26 = tpu.concatenate %24, %25 in 1 : vector<32x1xf32>, vector<32x15xf32> -> vector<32x16xf32>
    %cst_22 = arith.constant 0.000000e+00 : f32
    %27 = vector.broadcast %cst_22 : f32 to vector<32x1xf32>
    %28 = vector.extract_strided_slice %23 {offsets = [0, 1], sizes = [32, 15], strides = [1, 1]} : vector<32x16xf32> to vector<32x15xf32>
    %29 = tpu.concatenate %28, %27 in 1 : vector<32x15xf32>, vector<32x1xf32> -> vector<32x16xf32>
    %30 = tpu.concatenate %26, %23, %29 in 0 : vector<32x16xf32>, vector<32x16xf32>, vector<32x16xf32> -> vector<96x16xf32>
    %cst_23 = arith.constant dense<0.000000e+00> : vector<64x16xf32>
    %31 = tpu.matmul %3, %30, %cst_23 {dimension_numbers = #tpu.dot_dimension_numbers<[1], [0], [0], [1], [0, 0, 1, 1], [], []>} : vector<64x96xf32>, vector<96x16xf32>, vector<64x16xf32> -> vector<64x16xf32>
    %32 = vector.broadcast %4 : vector<64x1xf32> to vector<64x16xf32>
    %33 = arith.mulf %31, %32 : vector<64x16xf32>
    %34 = vector.broadcast %5 : vector<64x1xf32> to vector<64x16xf32>
    %35 = arith.addf %33, %34 : vector<64x16xf32>
    %cst_24 = arith.constant 0.000000e+00 : f32
    %36 = vector.broadcast %cst_24 : f32 to vector<64x16xf32>
    %37 = arith.maximumf %35, %36 : vector<64x16xf32>
    %cst_25 = arith.constant 0.000000e+00 : f32
    %38 = vector.broadcast %cst_25 : f32 to vector<64x1xf32>
    %39 = vector.extract_strided_slice %37 {offsets = [0, 0], sizes = [64, 15], strides = [1, 1]} : vector<64x16xf32> to vector<64x15xf32>
    %40 = tpu.concatenate %38, %39 in 1 : vector<64x1xf32>, vector<64x15xf32> -> vector<64x16xf32>
    %cst_26 = arith.constant 0.000000e+00 : f32
    %41 = vector.broadcast %cst_26 : f32 to vector<64x1xf32>
    %42 = vector.extract_strided_slice %37 {offsets = [0, 1], sizes = [64, 15], strides = [1, 1]} : vector<64x16xf32> to vector<64x15xf32>
    %43 = tpu.concatenate %42, %41 in 1 : vector<64x15xf32>, vector<64x1xf32> -> vector<64x16xf32>
    %44 = tpu.concatenate %40, %37, %43 in 0 : vector<64x16xf32>, vector<64x16xf32>, vector<64x16xf32> -> vector<192x16xf32>
    %cst_27 = arith.constant dense<0.000000e+00> : vector<4x16xf32>
    %45 = tpu.matmul %6, %44, %cst_27 {dimension_numbers = #tpu.dot_dimension_numbers<[1], [0], [0], [1], [0, 0, 1, 1], [], []>} : vector<4x192xf32>, vector<192x16xf32>, vector<4x16xf32> -> vector<4x16xf32>
    %46 = vector.broadcast %7 : vector<4x1xf32> to vector<4x16xf32>
    %47 = arith.addf %45, %46 : vector<4x16xf32>
    %c0_28 = arith.constant 0 : index
    %c0_29 = arith.constant 0 : index
    %c0_30 = arith.constant 0 : index
    %48 = vector.load %arg10[%c0_28, %c0_29, %c0_30] : memref<2x4x16xf32, #tpu.memory_space<vmem>>, vector<1x4x16xf32>
    %49 = vector.shape_cast %48 : vector<1x4x16xf32> to vector<4x16xf32>
    %50 = vector.shape_cast %47 : vector<4x16xf32> to vector<1x4x16xf32>
    tpu.vector_store %arg10[%c0_28, %c0_29, %c0_30], %50 {strides = array<i32>} : memref<2x4x16xf32, #tpu.memory_space<vmem>>, vector<1x4x16xf32>,
    %c1 = arith.constant 1 : index
    %c0_31 = arith.constant 0 : index
    %c0_32 = arith.constant 0 : index
    %51 = vector.load %arg1[%c1, %c0_31, %c0_32] : memref<2x4x16xf32, #tpu.memory_space<vmem>>, vector<1x4x16xf32>
    %52 = vector.shape_cast %51 : vector<1x4x16xf32> to vector<4x16xf32>
    %cst_33 = arith.constant 0.000000e+00 : f32
    %53 = vector.broadcast %cst_33 : f32 to vector<4x1xf32>
    %54 = vector.extract_strided_slice %52 {offsets = [0, 0], sizes = [4, 15], strides = [1, 1]} : vector<4x16xf32> to vector<4x15xf32>
    %55 = tpu.concatenate %53, %54 in 1 : vector<4x1xf32>, vector<4x15xf32> -> vector<4x16xf32>
    %cst_34 = arith.constant 0.000000e+00 : f32
    %56 = vector.broadcast %cst_34 : f32 to vector<4x1xf32>
    %57 = vector.extract_strided_slice %52 {offsets = [0, 1], sizes = [4, 15], strides = [1, 1]} : vector<4x16xf32> to vector<4x15xf32>
    %58 = tpu.concatenate %57, %56 in 1 : vector<4x15xf32>, vector<4x1xf32> -> vector<4x16xf32>
    %59 = tpu.concatenate %55, %52, %58 in 0 : vector<4x16xf32>, vector<4x16xf32>, vector<4x16xf32> -> vector<12x16xf32>
    %cst_35 = arith.constant dense<0.000000e+00> : vector<32x16xf32>
    %60 = tpu.matmul %0, %59, %cst_35 {dimension_numbers = #tpu.dot_dimension_numbers<[1], [0], [0], [1], [0, 0, 1, 1], [], []>} : vector<32x12xf32>, vector<12x16xf32>, vector<32x16xf32> -> vector<32x16xf32>
    %61 = vector.broadcast %1 : vector<32x1xf32> to vector<32x16xf32>
    %62 = arith.mulf %60, %61 : vector<32x16xf32>
    %63 = vector.broadcast %2 : vector<32x1xf32> to vector<32x16xf32>
    %64 = arith.addf %62, %63 : vector<32x16xf32>
    %cst_36 = arith.constant 0.000000e+00 : f32
    %65 = vector.broadcast %cst_36 : f32 to vector<32x16xf32>
    %66 = arith.maximumf %64, %65 : vector<32x16xf32>
    %cst_37 = arith.constant 0.000000e+00 : f32
    %67 = vector.broadcast %cst_37 : f32 to vector<32x1xf32>
    %68 = vector.extract_strided_slice %66 {offsets = [0, 0], sizes = [32, 15], strides = [1, 1]} : vector<32x16xf32> to vector<32x15xf32>
    %69 = tpu.concatenate %67, %68 in 1 : vector<32x1xf32>, vector<32x15xf32> -> vector<32x16xf32>
    %cst_38 = arith.constant 0.000000e+00 : f32
    %70 = vector.broadcast %cst_38 : f32 to vector<32x1xf32>
    %71 = vector.extract_strided_slice %66 {offsets = [0, 1], sizes = [32, 15], strides = [1, 1]} : vector<32x16xf32> to vector<32x15xf32>
    %72 = tpu.concatenate %71, %70 in 1 : vector<32x15xf32>, vector<32x1xf32> -> vector<32x16xf32>
    %73 = tpu.concatenate %69, %66, %72 in 0 : vector<32x16xf32>, vector<32x16xf32>, vector<32x16xf32> -> vector<96x16xf32>
    %cst_39 = arith.constant dense<0.000000e+00> : vector<64x16xf32>
    %74 = tpu.matmul %3, %73, %cst_39 {dimension_numbers = #tpu.dot_dimension_numbers<[1], [0], [0], [1], [0, 0, 1, 1], [], []>} : vector<64x96xf32>, vector<96x16xf32>, vector<64x16xf32> -> vector<64x16xf32>
    %75 = vector.broadcast %4 : vector<64x1xf32> to vector<64x16xf32>
    %76 = arith.mulf %74, %75 : vector<64x16xf32>
    %77 = vector.broadcast %5 : vector<64x1xf32> to vector<64x16xf32>
    %78 = arith.addf %76, %77 : vector<64x16xf32>
    %cst_40 = arith.constant 0.000000e+00 : f32
    %79 = vector.broadcast %cst_40 : f32 to vector<64x16xf32>
    %80 = arith.maximumf %78, %79 : vector<64x16xf32>
    %cst_41 = arith.constant 0.000000e+00 : f32
    %81 = vector.broadcast %cst_41 : f32 to vector<64x1xf32>
    %82 = vector.extract_strided_slice %80 {offsets = [0, 0], sizes = [64, 15], strides = [1, 1]} : vector<64x16xf32> to vector<64x15xf32>
    %83 = tpu.concatenate %81, %82 in 1 : vector<64x1xf32>, vector<64x15xf32> -> vector<64x16xf32>
    %cst_42 = arith.constant 0.000000e+00 : f32
    %84 = vector.broadcast %cst_42 : f32 to vector<64x1xf32>
    %85 = vector.extract_strided_slice %80 {offsets = [0, 1], sizes = [64, 15], strides = [1, 1]} : vector<64x16xf32> to vector<64x15xf32>
    %86 = tpu.concatenate %85, %84 in 1 : vector<64x15xf32>, vector<64x1xf32> -> vector<64x16xf32>
    %87 = tpu.concatenate %83, %80, %86 in 0 : vector<64x16xf32>, vector<64x16xf32>, vector<64x16xf32> -> vector<192x16xf32>
    %cst_43 = arith.constant dense<0.000000e+00> : vector<4x16xf32>
    %88 = tpu.matmul %6, %87, %cst_43 {dimension_numbers = #tpu.dot_dimension_numbers<[1], [0], [0], [1], [0, 0, 1, 1], [], []>} : vector<4x192xf32>, vector<192x16xf32>, vector<4x16xf32> -> vector<4x16xf32>
    %89 = vector.broadcast %7 : vector<4x1xf32> to vector<4x16xf32>
    %90 = arith.addf %88, %89 : vector<4x16xf32>
    %c1_44 = arith.constant 1 : index
    %c0_45 = arith.constant 0 : index
    %c0_46 = arith.constant 0 : index
    %91 = vector.load %arg10[%c1_44, %c0_45, %c0_46] : memref<2x4x16xf32, #tpu.memory_space<vmem>>, vector<1x4x16xf32>
    %92 = vector.shape_cast %91 : vector<1x4x16xf32> to vector<4x16xf32>
    %93 = vector.shape_cast %90 : vector<4x16xf32> to vector<1x4x16xf32>
    tpu.vector_store %arg10[%c1_44, %c0_45, %c0_46], %93 {strides = array<i32>} : memref<2x4x16xf32, #tpu.memory_space<vmem>>, vector<1x4x16xf32>,
    return
  }
  func.func @transform_0(%arg0: i32) -> (i32, i32, i32) {
    %c0_i32 = arith.constant 0 : i32
    %c0_i32_0 = arith.constant 0 : i32
    %c0_i32_1 = arith.constant 0 : i32
    return %arg0, %c0_i32, %c0_i32_0 : i32, i32, i32
  }
  func.func @transform_1(%arg0: i32) -> (i32, i32) {
    %c0_i32 = arith.constant 0 : i32
    %c0_i32_0 = arith.constant 0 : i32
    %c0_i32_1 = arith.constant 0 : i32
    return %c0_i32, %c0_i32_0 : i32, i32
  }
  func.func @transform_2(%arg0: i32) -> (i32, i32) {
    %c0_i32 = arith.constant 0 : i32
    %c0_i32_0 = arith.constant 0 : i32
    %c0_i32_1 = arith.constant 0 : i32
    return %c0_i32, %c0_i32_0 : i32, i32
  }
  func.func @transform_3(%arg0: i32) -> (i32, i32) {
    %c0_i32 = arith.constant 0 : i32
    %c0_i32_0 = arith.constant 0 : i32
    %c0_i32_1 = arith.constant 0 : i32
    return %c0_i32, %c0_i32_0 : i32, i32
  }
  func.func @transform_4(%arg0: i32) -> (i32, i32) {
    %c0_i32 = arith.constant 0 : i32
    %c0_i32_0 = arith.constant 0 : i32
    %c0_i32_1 = arith.constant 0 : i32
    return %c0_i32, %c0_i32_0 : i32, i32
  }
  func.func @transform_5(%arg0: i32) -> (i32, i32) {
    %c0_i32 = arith.constant 0 : i32
    %c0_i32_0 = arith.constant 0 : i32
    %c0_i32_1 = arith.constant 0 : i32
    return %c0_i32, %c0_i32_0 : i32, i32
  }
  func.func @transform_6(%arg0: i32) -> (i32, i32) {
    %c0_i32 = arith.constant 0 : i32
    %c0_i32_0 = arith.constant 0 : i32
    %c0_i32_1 = arith.constant 0 : i32
    return %c0_i32, %c0_i32_0 : i32, i32
  }
  func.func @transform_7(%arg0: i32) -> (i32, i32) {
    %c0_i32 = arith.constant 0 : i32
    %c0_i32_0 = arith.constant 0 : i32
    %c0_i32_1 = arith.constant 0 : i32
    return %c0_i32, %c0_i32_0 : i32, i32
  }
  func.func @transform_8(%arg0: i32) -> (i32, i32) {
    %c0_i32 = arith.constant 0 : i32
    %c0_i32_0 = arith.constant 0 : i32
    %c0_i32_1 = arith.constant 0 : i32
    return %c0_i32, %c0_i32_0 : i32, i32
  }
  func.func @transform_9(%arg0: i32) -> (i32, i32, i32) {
    %c0_i32 = arith.constant 0 : i32
    %c0_i32_0 = arith.constant 0 : i32
    %c0_i32_1 = arith.constant 0 : i32
    return %arg0, %c0_i32, %c0_i32_0 : i32, i32, i32
  }
}

</mosaic_0001>

<bundles_post_ra>
// kernel: tpu_custom_call.1
= control target key start
LH: loop header
LB: loop body
LE: loop exit
PB: predicated region body
PF: predicated region fallthrough
CT: control target
= control target key end

     0   :  { %s1667_s11 = smov 1   ;;  %vm87_vm0 = vcmask 97280   ;;  %v1668_v3 = vmov 0   ;;  %s1669_s16 = smov 127   ;;  %s2202_s0 = inlined_call_operand.vmem [shape: f32[2,4,16], index: 0, kind: input, shape index: {}]   ;;  %s2203_s1 = inlined_call_operand.vmem [shape: f32[32,12], index: 1, kind: input, shape index: {}]   ;;  %s2204_s2 = inlined_call_operand.vmem [shape: f32[32,1], index: 2, kind: input, shape index: {}]   ;;  %s2205_s3 = inlined_call_operand.vmem [shape: f32[32,1], index: 3, kind: input, shape index: {}]   ;;  %s2206_s4 = inlined_call_operand.vmem [shape: f32[64,96], index: 4, kind: input, shape index: {}]   ;;  %s2207_s5 = inlined_call_operand.vmem [shape: f32[64,1], index: 5, kind: input, shape index: {}]   ;;  %s2208_s6 = inlined_call_operand.vmem [shape: f32[64,1], index: 6, kind: input, shape index: {}]   ;;  %s2209_s7 = inlined_call_operand.vmem [shape: f32[4,192], index: 7, kind: input, shape index: {}]   ;;  %s2210_s8 = inlined_call_operand.vmem [shape: f32[4,1], index: 8, kind: input, shape index: {}]   ;;  %s2211_s9 = inlined_call_operand.hbm [shape: f32[2,4,16], index: 9, kind: output, shape index: {}]  }
   0x1   :  { %v71_v0 = vld [vmem:[%s2202_s0] sm:$0xf]  ;;  %1520 = vset.pattern.permute.xlu1 %v1668_v3  ;;  %1521 = vset.pattern.permute.xlu0 %v1668_v3  ;;  %v38_v4 = vld [vmem:[%s2204_s2 + $0x8] sm:$0xff] }
   0x2   :  { %73 = vrot.lane.b32.xlu0 %v71_v0, %s1667_s11  ;;  %v1732_v1 = vld [vmem:[%s2203_s1] sm:$0xff] }
   0x3   :  { %1260 = vmatprep.mubr.msk.f32.mxu1 %vm87_vm0, %v1732_v1  ;;  %v37_v2 = vld [vmem:[%s2204_s2] sm:$0xff] }
   0x4   :  { %190 = vperm.xlu1 %1520, %v37_v2   ;;  %v41_v5 = vld [vmem:[%s2205_s3] sm:$0xff] }
   0x6   :  { %78 = vrot.lane.b32.xlu0 %v71_v0, %s1669_s16 }
   0x7   :  { %14 = vsyncpa [#allocation3], 0  ;;  %v42_v6 = vld [vmem:[%s2205_s3 + $0x8] sm:$0xff]  ;;  %v40_v7 = vld [vmem:[%s2204_s2 + $0x18] sm:$0xff]  ;;  %vm76_vm1 = vcmask 7168   ;;  %v83_v12 = vrot.slane %v71_v0, 4 }
   0x8   :  { %195 = vperm.xlu1 %1520, %v38_v4   ;;  %v39_v8 = vld [vmem:[%s2204_s2 + $0x10] sm:$0xff]  ;;  %v44_v9 = vld [vmem:[%s2205_s3 + $0x18] sm:$0xff]  ;;  %vm81_vm2 = vcmask 121856   ;;  %vm85_vm3 = vcmask 1043456   ;;  %vm1670_vm4 = vmmov 1   ;;  %v1776_v19 = vld [vmem:[%s2203_s1 + $0x8] sm:$0xff] }
   0x9   :  { %v43_v10 = vld [vmem:[%s2205_s3 + $0x10] sm:$0xff]  ;;  %vm1765_vm5 = vmpackc.low %vm85_vm3, %vm1670_vm4  ;;  %v1790_v21 = vld [vmem:[%s2203_s1 + $0x18] sm:$0xff]  ;;  %vm276_vm6 = vcmask 785408   ;;  %vm589_vm10 = vcmask 523264   ;;  %vm662_vm11 = vcmask 125952  }
   0xa   :  { %214 = vperm.xlu0 %1521, %v41_v5   ;;  %v1781_v20 = vld [vmem:[%s2203_s1 + $0x10] sm:$0xff]  ;;  %v1153_v50 = vld [vmem:[%s2202_s0 + $0x4] sm:$0xf]  ;;  %vm1108_vm7 = vmneg %vm76_vm1 }
   0xb   :  { %v45_v51 = vld [vmem:[%s2206_s4] sm:$0xff]  ;;  %vm1832_vm8 = vmpackc.low %vm1108_vm7, %vm1108_vm7  ;;  %v675_v4 = vrot.slane %v1153_v50, 4  ;;  %v1896_v17 = vld [vmem:[%s2206_s4 + $0x28] sm:$0xff] }
   0xc   :  { %219 = vperm.xlu1 %1520, %v42_v6   ;;  %vm1846_vm9 = vmpackc.low %vm81_vm2, %vm81_vm2 }
   0xe   :  { %205 = vperm.xlu0 %1521, %v40_v7  }
  0x10   :  { %200 = vperm.xlu1 %1520, %v39_v8  }
  0x12   :  { %229 = vperm.xlu0 %1521, %v44_v9  }
  0x14   :  { %224 = vperm.xlu1 %1520, %v43_v10  }
  0x74   :  { %v74_v11 = vpop.permute.xlu0 %73 }
  0x75   :  { %v77_v13 = vsel %vm76_vm1, 0.0, %v74_v11 }
  0x76   :  { %v86_v16 = vsel %vm85_vm3, %v77_v13, %v83_v12 }
  0x78   :  { %v79_v14 = vpop.permute.xlu0 %78 }
  0x79   :  { %v82_v15 = vsel %vm81_vm2, %v79_v14, 0.0  ;;  %v1864_v14 = vld [vmem:[%s2206_s4 + $0x8] sm:$0xff] }
  0x7a   :  { %v1348_v18 = vpack.c.bf16 %v82_v15, %v86_v16  ;;  %v1871_v15 = vld [vmem:[%s2206_s4 + $0x10] sm:$0xff]  ;;  %v1882_v16 = vld [vmem:[%s2206_s4 + $0x18] sm:$0xff] }
  0x7c   :  { %1350 = vmatprep.subr.msk.bf16.mxu1 %vm1765_vm5, %v1348_v18 }
  0x7d   :  { %1353 = vmatpush3.bf16.msk.msra.mxu1 %vm1765_vm5, %v1348_v18  ;;  %v1887_v18 = vld [vmem:[%s2206_s4 + $0x20] sm:$0xff] }
  0x80   :  { %1261 = vmatmul.mubr.msk.f32.vlgmr.msra.gmra.mrb[0].mxu1 %vm87_vm0, %v1776_v19 }
  0x81   :  { %1263 = vmatprep.mubr.msk.f32.mxu1 %vm87_vm0, %v1781_v20 }
  0x83   :  { %v1794_v22 = vpop.permute.xlu1 %190 }
  0x84   :  { %1264 = vmatmul.mubr.msk.f32.gmra.mrb[2].mxu1 %vm87_vm0, %v1790_v21 }
  0x85   :  { %1290 = vmatprep.mubr.msk.f32.mxu1 %vm276_vm6, %v45_v51 }
  0x87   :  { %v1796_v23 = vpop.permute.xlu1 %195 }
  0x89   :  { %v1798_v24 = vpop.permute.xlu0 %214 }
  0x8b   :  { %v1800_v25 = vpop.permute.xlu1 %219 }
  0x8d   :  { %v1802_v26 = vpop.permute.xlu0 %205 }
  0x8f   :  { %v1804_v28 = vpop.permute.xlu1 %200 }
  0x91   :  { %v1811_v38 = vpop.permute.xlu0 %229 }
  0x93   :  { %v1814_v41 = vpop.permute.xlu1 %224 }
 0x153   :  { %v1262_v27 = vpop.f32.mrb[0].mxu1 }
 0x154   :  { %v209_v29 = vmul.f32 %v1262_v27, %v1796_v23  ;;  %v169_v30 = vpop.f32.mrb[1].mxu1  ;;  %v1901_v27 = vld [vmem:[%s2206_s4 + $0x30] sm:$0xff] }
 0x155   :  { %v208_v31 = vmul.f32 %v1794_v22, %v169_v30 }
 0x156   :  { %v233_v32 = vadd.f32 %v1800_v25, %v209_v29  ;;  %v1910_v29 = vld [vmem:[%s2206_s4 + $0x38] sm:$0xff] }
 0x157   :  { %v232_v33 = vadd.f32 %v1798_v24, %v208_v31  ;;  %v1265_v34 = vpop.f32.mrb[2].mxu1 }
 0x158   :  { %v237_v35 = vmax.f32 %v233_v32, 0.0  ;;  %v211_v36 = vmul.f32 %v1265_v34, %v1802_v26  ;;  %v179_v37 = vpop.f32.mrb[3].mxu1 }
 0x159   :  { %v236_v39 = vmax.f32 %v232_v33, 0.0  ;;  %v210_v40 = vmul.f32 %v1804_v28, %v179_v37 }
 0x15a   :  { %v235_v42 = vadd.f32 %v1811_v38, %v211_v36 }
 0x15b   :  { %v234_v43 = vadd.f32 %v1814_v41, %v210_v40  ;;  %v1522_v44 = vpack.i.bf16 %v237_v35, %v236_v39  ;;  %v1366_v45 = vpack.c.bf16 %v237_v35, %v236_v39 }
 0x15c   :  { %v239_v46 = vmax.f32 %v235_v42, 0.0 }
 0x15d   :  { %v238_v47 = vmax.f32 %v234_v43, 0.0  ;;  %1523 = vrot.lane.b32.xlu1 %v1522_v44, %s1667_s11 }
 0x15f   :  { %v1527_v48 = vpack.i.bf16 %v239_v46, %v238_v47  ;;  %v1370_v49 = vpack.c.bf16 %v239_v46, %v238_v47 }
 0x161   :  { %1533 = vrot.lane.b32.xlu1 %v1522_v44, %s1669_s16  ;;  %1528 = vrot.lane.b32.xlu0 %v1527_v48, %s1667_s11 }
 0x165   :  { %1538 = vrot.lane.b32.xlu0 %v1527_v48, %s1669_s16  ;;  %667 = vrot.lane.b32.xlu1 %v1153_v50, %s1667_s11 }
 0x169   :  { %671 = vrot.lane.b32.xlu0 %v1153_v50, %s1669_s16 }
 0x1cf   :  { %v1524_v52 = vpop.permute.xlu1 %1523 }
 0x1d0   :  { %v1526_v53 = vunpack.i.h.bf16 %v1524_v52  ;;  %v1525_v54 = vunpack.i.l.bf16 %v1524_v52  ;;  %v62_v52 = vld [vmem:[%s2208_s6 + $0x8] sm:$0xff] }
 0x1d2   :  { %v1354_v56 = vpack.c.bf16 %v1526_v53, %v1525_v54  ;;  %v63_v53 = vld [vmem:[%s2208_s6 + $0x10] sm:$0xff]  ;;  %v56_v54 = vld [vmem:[%s2207_s5 + $0x18] sm:$0xff] }
 0x1d3   :  { %v1529_v57 = vpop.permute.xlu0 %1528  ;;  %v1534_v61 = vpop.permute.xlu1 %1533 }
 0x1d4   :  { %v1531_v58 = vunpack.i.h.bf16 %v1529_v57  ;;  %v1530_v59 = vunpack.i.l.bf16 %v1529_v57  ;;  %1356 = vmatprep.subr.msk.bf16.mxu1 %vm1832_vm8, %v1354_v56  ;;  %v1536_v62 = vunpack.i.h.bf16 %v1534_v61  ;;  %v1535_v63 = vunpack.i.l.bf16 %v1534_v61  ;;  %v64_v57 = vld [vmem:[%s2208_s6 + $0x18] sm:$0xff]  ;;  %v66_v61 = vld [vmem:[%s2208_s6 + $0x28] sm:$0xff] }
 0x1d5   :  { %1359 = vmatpush3.bf16.msk.msra.mxu1 %vm1832_vm8, %v1354_v56  ;;  %v57_v56 = vld [vmem:[%s2207_s5 + $0x20] sm:$0xff] }
 0x1d6   :  { %v1360_v60 = vpack.c.bf16 %v1531_v58, %v1530_v59  ;;  %v1374_v5 = vpack.c.bf16 %v1536_v62, %v1535_v63  ;;  %v65_v58 = vld [vmem:[%s2208_s6 + $0x20] sm:$0xff]  ;;  %v58_v59 = vld [vmem:[%s2207_s5 + $0x28] sm:$0xff]  ;;  %v67_v62 = vld [vmem:[%s2208_s6 + $0x30] sm:$0xff] }
 0x1d7   :  { %v1539_v0 = vpop.permute.xlu0 %1538  ;;  %v668_v2 = vpop.permute.xlu1 %667  ;;  %v60_v63 = vld [vmem:[%s2207_s5 + $0x38] sm:$0xff] }
 0x1d8   :  { %1362 = vmatprep.subr.msk.bf16.mxu1 %vm1832_vm8, %v1360_v60  ;;  %v1541_v6 = vunpack.i.h.bf16 %v1539_v0  ;;  %v1540_v7 = vunpack.i.l.bf16 %v1539_v0  ;;  %v670_v8 = vsel %vm76_vm1, 0.0, %v668_v2  ;;  %v68_v0 = vld [vmem:[%s2208_s6 + $0x38] sm:$0xff] }
 0x1d9   :  { %1365 = vmatpush3.bf16.msk.msra.mxu1 %vm1832_vm8, %v1360_v60  ;;  %v677_v10 = vsel %vm85_vm3, %v670_v8, %v675_v4  ;;  %v59_v60 = vld [vmem:[%s2207_s5 + $0x30] sm:$0xff] }
 0x1da   :  { %1367 = vmatprep.subr.bf16.mxu1 %v1366_v45  ;;  %v1380_v12 = vpack.c.bf16 %v1541_v6, %v1540_v7 }
 0x1db   :  { %v672_v9 = vpop.permute.xlu0 %671 }
 0x1dc   :  { %v674_v11 = vsel %vm81_vm2, %v672_v9, 0.0 }
 0x1dd   :  { %1369 = vmatpush3.bf16.msra.mxu1 %v1366_v45  ;;  %v1430_v13 = vpack.c.bf16 %v674_v11, %v677_v10 }
 0x1de   :  { %1371 = vmatprep.subr.bf16.mxu1 %v1370_v49 }
 0x1e1   :  { %1373 = vmatpush3.bf16.msra.mxu1 %v1370_v49 }
 0x1e2   :  { %1376 = vmatprep.subr.msk.bf16.mxu1 %vm1846_vm9, %v1374_v5 }
 0x1e5   :  { %1379 = vmatpush3.bf16.msk.msra.mxu1 %vm1846_vm9, %v1374_v5 }
 0x1e6   :  { %1382 = vmatprep.subr.msk.bf16.mxu1 %vm1846_vm9, %v1380_v12 }
 0x1e9   :  { %1385 = vmatpush3.bf16.msk.msra.mxu1 %vm1846_vm9, %v1380_v12 }
 0x1ea   :  { %1432 = vmatprep.subr.msk.bf16.mxu1 %vm1765_vm5, %v1430_v13 }
 0x1ec   :  { %1291 = vmatmul.mubr.msk.f32.vlgmr.msra.gmra.mrb[4].mxu1 %vm276_vm6, %v1864_v14 }
 0x1ed   :  { %1435 = vmatpush3.bf16.msk.msra.mxu1 %vm1765_vm5, %v1430_v13  ;;  %1293 = vmatprep.mubr.msk.f32.mxu1 %vm276_vm6, %v1871_v15 }
 0x1f0   :  { %1294 = vmatmul.mubr.msk.f32.gmra.mrb[6].mxu1 %vm276_vm6, %v1882_v16 }
 0x1f1   :  { %1296 = vmatprep.mubr.msk.f32.mxu1 %vm276_vm6, %v1887_v18 }
 0x1f4   :  { %1297 = vmatmul.mubr.msk.f32.gmra.mrb[8].mxu1 %vm276_vm6, %v1896_v17 }
 0x1f5   :  { %1299 = vmatprep.mubr.msk.f32.mxu1 %vm276_vm6, %v1901_v27 }
 0x1f8   :  { %1300 = vmatmul.mubr.msk.f32.gmra.mrb[10].mxu1 %vm276_vm6, %v1910_v29 }
 0x1f9   :  { %1306 = vmatprep.mubr.msk.f32.mxu1 %vm87_vm0, %v1732_v1 }
 0x1fc   :  { %1307 = vmatmul.mubr.msk.f32.vlgmr.msra.gmra.mrb[12].mxu1 %vm87_vm0, %v1776_v19 }
 0x1fd   :  { %1309 = vmatprep.mubr.msk.f32.mxu1 %vm87_vm0, %v1781_v20 }
 0x200   :  { %1310 = vmatmul.mubr.msk.f32.gmra.mrb[14].mxu1 %vm87_vm0, %v1790_v21 }
 0x201   :  { %1336 = vmatprep.mubr.msk.f32.mxu1 %vm276_vm6, %v45_v51 }
 0x2bf   :  { %v1923_v30 = vpop.f32.mrb[4].mxu1 }
 0x2c0   :  { %v1925_v31 = vpop.f32.mrb[5].mxu1 }
 0x2c3   :  { %v1927_v32 = vpop.f32.mrb[6].mxu1 }
 0x2c4   :  { %v1929_v33 = vpop.f32.mrb[7].mxu1 }
 0x2c7   :  { %v1931_v1 = vpop.f32.mrb[8].mxu1 }
 0x2c8   :  { %v1933_v34 = vpop.f32.mrb[9].mxu1 }
 0x2cb   :  { %v1935_v19 = vpop.f32.mrb[10].mxu1 }
 0x2cc   :  { %v1937_v20 = vpop.f32.mrb[11].mxu1 }
 0x2cf   :  { %v1308_v35 = vpop.f32.mrb[12].mxu1 }
 0x2d0   :  { %v767_v21 = vmul.f32 %v1308_v35, %v1796_v23  ;;  %v747_v36 = vpop.f32.mrb[13].mxu1 }
 0x2d1   :  { %v766_v37 = vmul.f32 %v747_v36, %v1794_v22 }
 0x2d2   :  { %v771_v39 = vadd.f32 %v767_v21, %v1800_v25 }
 0x2d3   :  { %v770_v40 = vadd.f32 %v766_v37, %v1798_v24  ;;  %v1311_v42 = vpop.f32.mrb[14].mxu1 }
 0x2d4   :  { %v775_v43 = vmax.f32 %v771_v39, 0.0  ;;  %v769_v44 = vmul.f32 %v1311_v42, %v1802_v26  ;;  %v757_v45 = vpop.f32.mrb[15].mxu1  ;;  %v53_v26 = vld [vmem:[%s2207_s5] sm:$0xff] }
 0x2d5   :  { %v774_v46 = vmax.f32 %v770_v40, 0.0  ;;  %v768_v47 = vmul.f32 %v757_v45, %v1804_v28  ;;  %v61_v28 = vld [vmem:[%s2208_s6] sm:$0xff]  ;;  %v1671_v45 = vmov 0.0|0.0  }
 0x2d6   :  { %v773_v48 = vadd.f32 %v769_v44, %v1811_v38  ;;  %v54_v38 = vld [vmem:[%s2207_s5 + $0x8] sm:$0xff]  ;;  %1386 = vmatprep.subr.bf16.mxu0 %v1671_v45 }
 0x2d7   :  { %v772_v49 = vadd.f32 %v768_v47, %v1814_v41  ;;  %v1542_v23 = vpack.i.bf16 %v775_v43, %v774_v46  ;;  %v1448_v50 = vpack.c.bf16 %v775_v43, %v774_v46  ;;  %v55_v41 = vld [vmem:[%s2207_s5 + $0x10] sm:$0xff] }
 0x2d8   :  { %v777_v51 = vmax.f32 %v773_v48, 0.0 }
 0x2d9   :  { %v776_v22 = vmax.f32 %v772_v49, 0.0  ;;  %1543 = vrot.lane.b32.xlu1 %v1542_v23, %s1667_s11 }
 0x2db   :  { %v1547_v25 = vpack.i.bf16 %v777_v51, %v776_v22  ;;  %v1452_v24 = vpack.c.bf16 %v777_v51, %v776_v22 }
 0x2dd   :  { %1553 = vrot.lane.b32.xlu1 %v1542_v23, %s1669_s16  ;;  %1548 = vrot.lane.b32.xlu0 %v1547_v25, %s1667_s11 }
 0x2e1   :  { %408 = vperm.xlu1 %1520, %v53_v26   ;;  %1558 = vrot.lane.b32.xlu0 %v1547_v25, %s1669_s16 }
 0x2e5   :  { %456 = vperm.xlu1 %1520, %v61_v28   ;;  %413 = vperm.xlu0 %1521, %v54_v38  }
 0x2e9   :  { %418 = vperm.xlu1 %1520, %v55_v41   ;;  %461 = vperm.xlu0 %1521, %v62_v52  }
 0x2ed   :  { %466 = vperm.xlu1 %1520, %v63_v53   ;;  %423 = vperm.xlu0 %1521, %v56_v54  }
 0x2f1   :  { %428 = vperm.xlu1 %1520, %v57_v56   ;;  %471 = vperm.xlu0 %1521, %v64_v57  }
 0x2f5   :  { %476 = vperm.xlu1 %1520, %v65_v58   ;;  %433 = vperm.xlu0 %1521, %v58_v59  }
 0x2f9   :  { %438 = vperm.xlu1 %1520, %v59_v60   ;;  %481 = vperm.xlu0 %1521, %v66_v61  }
 0x2fd   :  { %486 = vperm.xlu1 %1520, %v67_v62   ;;  %443 = vperm.xlu0 %1521, %v60_v63  }
 0x301   :  { %491 = vperm.xlu0 %1521, %v68_v0  }
 0x34b   :  { %v1544_v2 = vpop.permute.xlu1 %1543 }
 0x34c   :  { %v1546_v4 = vunpack.i.h.bf16 %v1544_v2  ;;  %v1545_v5 = vunpack.i.l.bf16 %v1544_v2 }
 0x34e   :  { %v1436_v6 = vpack.c.bf16 %v1546_v4, %v1545_v5 }
 0x34f   :  { %v1549_v7 = vpop.permute.xlu0 %1548  ;;  %v1554_v11 = vpop.permute.xlu1 %1553 }
 0x350   :  { %v1551_v8 = vunpack.i.h.bf16 %v1549_v7  ;;  %v1550_v9 = vunpack.i.l.bf16 %v1549_v7  ;;  %1438 = vmatprep.subr.msk.bf16.mxu1 %vm1832_vm8, %v1436_v6  ;;  %v1556_v12 = vunpack.i.h.bf16 %v1554_v11  ;;  %v1555_v13 = vunpack.i.l.bf16 %v1554_v11 }
 0x351   :  { %1441 = vmatpush3.bf16.msk.msra.mxu1 %vm1832_vm8, %v1436_v6 }
 0x352   :  { %v1442_v10 = vpack.c.bf16 %v1551_v8, %v1550_v9  ;;  %v1456_v21 = vpack.c.bf16 %v1556_v12, %v1555_v13 }
 0x353   :  { %v1559_v35 = vpop.permute.xlu0 %1558 }
 0x354   :  { %1444 = vmatprep.subr.msk.bf16.mxu1 %vm1832_vm8, %v1442_v10  ;;  %v1561_v36 = vunpack.i.h.bf16 %v1559_v35  ;;  %v1560_v37 = vunpack.i.l.bf16 %v1559_v35 }
 0x355   :  { %1447 = vmatpush3.bf16.msk.msra.mxu1 %vm1832_vm8, %v1442_v10 }
 0x356   :  { %1449 = vmatprep.subr.bf16.mxu1 %v1448_v50  ;;  %v1462_v39 = vpack.c.bf16 %v1561_v36, %v1560_v37 }
 0x359   :  { %1451 = vmatpush3.bf16.msra.mxu1 %v1448_v50 }
 0x35a   :  { %1453 = vmatprep.subr.bf16.mxu1 %v1452_v24 }
 0x35d   :  { %1455 = vmatpush3.bf16.msra.mxu1 %v1452_v24 }
 0x35e   :  { %1458 = vmatprep.subr.msk.bf16.mxu1 %vm1846_vm9, %v1456_v21 }
 0x360   :  { %v2009_v40 = vpop.permute.xlu1 %408 }
 0x361   :  { %1461 = vmatpush3.bf16.msk.msra.mxu1 %vm1846_vm9, %v1456_v21  ;;  %v446_v44 = vmul.f32 %v2009_v40, %v1925_v31 }
 0x362   :  { %1464 = vmatprep.subr.msk.bf16.mxu1 %vm1846_vm9, %v1462_v39 }
 0x364   :  { %v2015_v42 = vpop.permute.xlu1 %456  ;;  %v2017_v43 = vpop.permute.xlu0 %413 }
 0x365   :  { %1467 = vmatpush3.bf16.msk.msra.mxu1 %vm1846_vm9, %v1462_v39  ;;  %v494_v46 = vadd.f32 %v2015_v42, %v446_v44  ;;  %v447_v47 = vmul.f32 %v1923_v30, %v2017_v43 }
 0x367   :  { %v502_v23 = vmax.f32 %v494_v46, 0.0 }
 0x368   :  { %v2027_v48 = vpop.permute.xlu1 %418  ;;  %v2029_v49 = vpop.permute.xlu0 %461  ;;  %1337 = vmatmul.mubr.msk.f32.vlgmr.msra.gmra.mrb[16].mxu1 %vm276_vm6, %v1864_v14 }
 0x369   :  { %v495_v31 = vadd.f32 %v2029_v49, %v447_v47  ;;  %1339 = vmatprep.mubr.msk.f32.mxu1 %vm276_vm6, %v1871_v15  ;;  %v448_v30 = vmul.f32 %v2027_v48, %v1929_v33 }
 0x36b   :  { %v503_v50 = vmax.f32 %v495_v31, 0.0 }
 0x36c   :  { %v2036_v51 = vpop.permute.xlu1 %466  ;;  %v2038_v22 = vpop.permute.xlu0 %423  ;;  %1340 = vmatmul.mubr.msk.f32.gmra.mrb[18].mxu1 %vm276_vm6, %v1882_v16 }
 0x36d   :  { %v1562_v25 = vpack.i.bf16 %v503_v50, %v502_v23  ;;  %1342 = vmatprep.mubr.msk.f32.mxu1 %vm276_vm6, %v1887_v18  ;;  %v2046_v14 = vpack.c.bf16 %v503_v50, %v502_v23  ;;  %v496_v15 = vadd.f32 %v2036_v51, %v448_v30  ;;  %v449_v24 = vmul.f32 %v1927_v32, %v2038_v22 }
 0x36f   :  { %1563 = vrot.lane.b32.xlu1 %v1562_v25, %s1667_s11  ;;  %v504_v18 = vmax.f32 %v496_v15, 0.0 }
 0x370   :  { %v2052_v26 = vpop.permute.xlu1 %428  ;;  %v2054_v28 = vpop.permute.xlu0 %471  ;;  %1343 = vmatmul.mubr.msk.f32.gmra.mrb[20].mxu1 %vm276_vm6, %v1896_v17 }
 0x371   :  { %v497_v16 = vadd.f32 %v2054_v28, %v449_v24  ;;  %1345 = vmatprep.mubr.msk.f32.mxu1 %vm276_vm6, %v1901_v27  ;;  %v450_v32 = vmul.f32 %v2052_v26, %v1933_v34 }
 0x373   :  { %v505_v33 = vmax.f32 %v497_v16, 0.0 }
 0x374   :  { %v2061_v38 = vpop.permute.xlu1 %476  ;;  %v2063_v41 = vpop.permute.xlu0 %433  ;;  %1346 = vmatmul.mubr.msk.f32.gmra.mrb[22].mxu1 %vm276_vm6, %v1910_v29 }
 0x375   :  { %v1567_v52 = vpack.i.bf16 %v505_v33, %v504_v18  ;;  %v1406_v53 = vpack.c.bf16 %v505_v33, %v504_v18  ;;  %v498_v17 = vadd.f32 %v2061_v38, %v450_v32  ;;  %v451_v54 = vmul.f32 %v1931_v1, %v2063_v41 }
 0x377   :  { %1568 = vrot.lane.b32.xlu0 %v1567_v52, %s1667_s11  ;;  %v506_v58 = vmax.f32 %v498_v17, 0.0 }
 0x378   :  { %v2073_v27 = vpop.permute.xlu1 %438  ;;  %v2075_v56 = vpop.permute.xlu0 %481 }
 0x379   :  { %v499_v57 = vadd.f32 %v2075_v56, %v451_v54  ;;  %v452_v60 = vmul.f32 %v2073_v27, %v1937_v20 }
 0x37b   :  { %v507_v29 = vmax.f32 %v499_v57, 0.0 }
 0x37c   :  { %v2078_v59 = vpop.permute.xlu1 %486  ;;  %v2080_v34 = vpop.permute.xlu0 %443 }
 0x37d   :  { %v1572_v61 = vpack.i.bf16 %v507_v29, %v506_v58  ;;  %v1409_v62 = vpack.c.bf16 %v507_v29, %v506_v58  ;;  %v500_v1 = vadd.f32 %v2078_v59, %v452_v60  ;;  %v453_v63 = vmul.f32 %v1935_v19, %v2080_v34  ;;  %v2099_v19 = vld [vmem:[%s2209_s7] sm:$0xff] }
 0x37e   :  { %v588_v20 = vcombine.high %v2099_v19, %v2099_v19 }
 0x37f   :  { %1573 = vrot.lane.b32.xlu1 %v1572_v61, %s1667_s11  ;;  %v508_v4 = vmax.f32 %v500_v1, 0.0 }
 0x380   :  { %v2088_v0 = vpop.permute.xlu0 %491  ;;  %1152 = vmatprep.mubr.msk.f32.mxu0 %vm589_vm10, %v588_v20 }
 0x381   :  { %v501_v2 = vadd.f32 %v2088_v0, %v453_v63 }
 0x383   :  { %v509_v5 = vmax.f32 %v501_v2, 0.0  ;;  %1583 = vrot.lane.b32.xlu1 %v1562_v25, %s1669_s16 }
 0x385   :  { %v1577_v6 = vpack.i.bf16 %v509_v5, %v508_v4  ;;  %v1412_v7 = vpack.c.bf16 %v509_v5, %v508_v4 }
 0x387   :  { %1593 = vrot.lane.b32.xlu1 %v1572_v61, %s1669_s16  ;;  %1578 = vrot.lane.b32.xlu0 %v1577_v6, %s1667_s11 }
 0x38b   :  { %1588 = vrot.lane.b32.xlu0 %v1567_v52, %s1669_s16 }
 0x38f   :  { %1598 = vrot.lane.b32.xlu0 %v1577_v6, %s1669_s16 }
 0x3e1   :  { %v1564_v8 = vpop.permute.xlu1 %1563 }
 0x3e2   :  { %v1566_v9 = vunpack.i.h.bf16 %v1564_v8  ;;  %v1565_v10 = vunpack.i.l.bf16 %v1564_v8 }
 0x3e4   :  { %v1387_v11 = vpack.c.bf16 %v1566_v9, %v1565_v10 }
 0x3e6   :  { %1389 = vmatpush1.bf16.msk.msra.mxu0 %vm1832_vm8, %v1387_v11 }
 0x3e7   :  { %1390 = vmatprep.subr.bf16.mxu0 %v1671_v45 }
 0x3e9   :  { %v1569_v12 = vpop.permute.xlu0 %1568 }
 0x3ea   :  { %v1571_v13 = vunpack.i.h.bf16 %v1569_v12  ;;  %v1570_v35 = vunpack.i.l.bf16 %v1569_v12 }
 0x3ec   :  { %v1391_v21 = vpack.c.bf16 %v1571_v13, %v1570_v35 }
 0x3ee   :  { %1393 = vmatpush1.bf16.msk.msra.mxu0 %vm1832_vm8, %v1391_v21 }
 0x3ef   :  { %1394 = vmatprep.subr.bf16.mxu0 %v1671_v45 }
 0x3f1   :  { %v1574_v36 = vpop.permute.xlu1 %1573 }
 0x3f2   :  { %v1576_v37 = vunpack.i.h.bf16 %v1574_v36  ;;  %v1575_v39 = vunpack.i.l.bf16 %v1574_v36 }
 0x3f4   :  { %v1395_v44 = vpack.c.bf16 %v1576_v37, %v1575_v39 }
 0x3f5   :  { %v1584_v50 = vpop.permute.xlu1 %1583 }
 0x3f6   :  { %1397 = vmatpush1.bf16.msk.msra.mxu0 %vm1832_vm8, %v1395_v44  ;;  %v1586_v30 = vunpack.i.h.bf16 %v1584_v50  ;;  %v1585_v25 = vunpack.i.l.bf16 %v1584_v50 }
 0x3f7   :  { %1398 = vmatprep.subr.bf16.mxu0 %v1671_v45 }
 0x3f8   :  { %v1415_v24 = vpack.c.bf16 %v1586_v30, %v1585_v25 }
 0x3f9   :  { %v1579_v46 = vpop.permute.xlu0 %1578  ;;  %v1594_v33 = vpop.permute.xlu1 %1593 }
 0x3fa   :  { %v1581_v47 = vunpack.i.h.bf16 %v1579_v46  ;;  %v1580_v31 = vunpack.i.l.bf16 %v1579_v46  ;;  %v1595_v32 = vunpack.i.l.bf16 %v1594_v33 }
 0x3fc   :  { %v1399_v23 = vpack.c.bf16 %v1581_v47, %v1580_v31 }
 0x3fd   :  { %v1589_v15 = vpop.permute.xlu0 %1588 }
 0x3fe   :  { %1401 = vmatpush1.bf16.msk.msra.mxu0 %vm1832_vm8, %v1399_v23  ;;  %v1591_v16 = vunpack.i.h.bf16 %v1589_v15  ;;  %v1590_v18 = vunpack.i.l.bf16 %v1589_v15 }
 0x3ff   :  { %1402 = vmatprep.subr.bf16.mxu0 %v1671_v45 }
 0x400   :  { %v1419_v52 = vpack.c.bf16 %v1591_v16, %v1590_v18 }
 0x402   :  { %1404 = vmatpush1.bf16.msra.mxu0 %v2046_v14  ;;  %v1596_v14 = vunpack.i.h.bf16 %v1594_v33 }
 0x403   :  { %1405 = vmatprep.subr.bf16.mxu0 %v1671_v45 }
 0x404   :  { %v1423_v17 = vpack.c.bf16 %v1596_v14, %v1595_v32 }
 0x406   :  { %1407 = vmatpush1.bf16.msra.mxu0 %v1406_v53  ;;  %v1599_v53 = vpop.permute.xlu0 %1598 }
 0x407   :  { %1408 = vmatprep.subr.bf16.mxu0 %v1671_v45  ;;  %v1601_v54 = vunpack.i.h.bf16 %v1599_v53  ;;  %v1600_v57 = vunpack.i.l.bf16 %v1599_v53 }
 0x409   :  { %v1427_v58 = vpack.c.bf16 %v1601_v54, %v1600_v57 }
 0x40a   :  { %1410 = vmatpush1.bf16.msra.mxu0 %v1409_v62 }
 0x40b   :  { %1411 = vmatprep.subr.bf16.mxu0 %v1671_v45 }
 0x40e   :  { %1413 = vmatpush1.bf16.msra.mxu0 %v1412_v7 }
 0x40f   :  { %1414 = vmatprep.subr.bf16.mxu0 %v1671_v45 }
 0x412   :  { %1417 = vmatpush1.bf16.msk.msra.mxu0 %vm1846_vm9, %v1415_v24 }
 0x413   :  { %1418 = vmatprep.subr.bf16.mxu0 %v1671_v45 }
 0x416   :  { %1421 = vmatpush1.bf16.msk.msra.mxu0 %vm1846_vm9, %v1419_v52 }
 0x417   :  { %1422 = vmatprep.subr.bf16.mxu0 %v1671_v45 }
 0x41a   :  { %1425 = vmatpush1.bf16.msk.msra.mxu0 %vm1846_vm9, %v1423_v17 }
 0x41b   :  { %1426 = vmatprep.subr.bf16.mxu0 %v1671_v45 }
 0x41e   :  { %1429 = vmatpush1.bf16.msk.msra.mxu0 %vm1846_vm9, %v1427_v58 }
 0x41f   :  { %1468 = vmatprep.subr.bf16.mxu0 %v1671_v45 }
 0x421   :  { %657 = vmatmul.mubr.f32.vlgmr.msra.gmra.mrb[0].mxu0 %v2099_v19 }
 0x422   :  { %1203 = vmatprep.mubr.msk.f32.mxu0 %vm589_vm10, %v588_v20 }
 0x43b   :  { %v1338_v29 = vpop.f32.mrb[16].mxu1 }
 0x43c   :  { %v920_v60 = vmul.f32 %v1338_v29, %v2017_v43  ;;  %v880_v61 = vpop.f32.mrb[17].mxu1 }
 0x43d   :  { %v919_v62 = vmul.f32 %v880_v61, %v2009_v40 }
 0x43e   :  { %v928_v1 = vadd.f32 %v920_v60, %v2029_v49 }
 0x43f   :  { %v927_v63 = vadd.f32 %v919_v62, %v2015_v42  ;;  %v1341_v2 = vpop.f32.mrb[18].mxu1 }
 0x440   :  { %v936_v4 = vmax.f32 %v928_v1, 0.0  ;;  %v922_v5 = vmul.f32 %v1341_v2, %v2038_v22  ;;  %v890_v6 = vpop.f32.mrb[19].mxu1 }
 0x441   :  { %v935_v7 = vmax.f32 %v927_v63, 0.0  ;;  %v921_v8 = vmul.f32 %v890_v6, %v2027_v48 }
 0x442   :  { %v930_v20 = vadd.f32 %v922_v5, %v2054_v28 }
 0x443   :  { %v929_v9 = vadd.f32 %v921_v8, %v2036_v51  ;;  %v1344_v43 = vpop.f32.mrb[20].mxu1  ;;  %v1602_v10 = vpack.i.bf16 %v936_v4, %v935_v7  ;;  %v1485_v11 = vpack.c.bf16 %v936_v4, %v935_v7 }
 0x444   :  { %v938_v40 = vmax.f32 %v930_v20, 0.0  ;;  %v924_v49 = vmul.f32 %v1344_v43, %v2063_v41  ;;  %v900_v12 = vpop.f32.mrb[21].mxu1 }
 0x445   :  { %v937_v42 = vmax.f32 %v929_v9, 0.0  ;;  %v923_v13 = vmul.f32 %v900_v12, %v2052_v26  ;;  %1603 = vrot.lane.b32.xlu1 %v1602_v10, %s1667_s11 }
 0x446   :  { %v932_v22 = vadd.f32 %v924_v49, %v2075_v56 }
 0x447   :  { %v931_v48 = vadd.f32 %v923_v13, %v2061_v38  ;;  %v1347_v35 = vpop.f32.mrb[22].mxu1  ;;  %v1607_v28 = vpack.i.bf16 %v938_v40, %v937_v42  ;;  %v1488_v21 = vpack.c.bf16 %v938_v40, %v937_v42 }
 0x448   :  { %v940_v51 = vmax.f32 %v932_v22, 0.0  ;;  %v926_v36 = vmul.f32 %v1347_v35, %v2080_v34  ;;  %v910_v37 = vpop.f32.mrb[23].mxu1 }
 0x449   :  { %v939_v39 = vmax.f32 %v931_v48, 0.0  ;;  %v925_v41 = vmul.f32 %v910_v37, %v2073_v27  ;;  %1608 = vrot.lane.b32.xlu0 %v1607_v28, %s1667_s11  ;;  %v70_v27 = vld [vmem:[%s2210_s8] sm:$0xf]  ;;  %s1672_s8 = smov [#allocation2]  }
 0x44a   :  { %v934_v26 = vadd.f32 %v926_v36, %v2088_v0 }
 0x44b   :  { %v933_v44 = vadd.f32 %v925_v41, %v2078_v59  ;;  %v1612_v46 = vpack.i.bf16 %v940_v51, %v939_v39  ;;  %v1491_v56 = vpack.c.bf16 %v940_v51, %v939_v39 }
 0x44c   :  { %v942_v47 = vmax.f32 %v934_v26, 0.0 }
 0x44d   :  { %v941_v38 = vmax.f32 %v933_v44, 0.0  ;;  %1613 = vrot.lane.b32.xlu1 %v1612_v46, %s1667_s11 }
 0x44f   :  { %v1617_v31 = vpack.i.bf16 %v942_v47, %v941_v38  ;;  %v1494_v23 = vpack.c.bf16 %v942_v47, %v941_v38 }
 0x451   :  { %1623 = vrot.lane.b32.xlu1 %v1602_v10, %s1669_s16  ;;  %1618 = vrot.lane.b32.xlu0 %v1617_v31, %s1667_s11  ;;  %s1092_s11 = sshll.u32 %s1672_s8, 4  ;;  %s1093_s11 = int_to_ptr.vmem [resolvable:$true] %s1092_s11 }
 0x452   :  { %p1648_p1 = scmp.lt.s32.totalorder %s1093_s11, %s1093_s11 }
 0x455   :  { %1633 = vrot.lane.b32.xlu1 %v1612_v46, %s1669_s16  ;;  %1628 = vrot.lane.b32.xlu0 %v1607_v28, %s1669_s16 }
 0x459   :  { %584 = vperm.xlu1 %1520, %v70_v27   ;;  %1638 = vrot.lane.b32.xlu0 %v1617_v31, %s1669_s16  ;;  %s1643_s16 = scalar_lea.vmem %s1093_s11, 128 }
 0x45a   :  { %p1644_p0 = scmp.ne.s32.totalorder %s1093_s11, %s1643_s16  ;;  %p1649_p2 = scmp.lt.s32.totalorder %s1643_s16, %s1643_s16 }
 0x45c   :  { %p1650_p3 = por %p1649_p2, %p1648_p1 }
 0x45e   :  { %p1651_p4 = pnand %p1650_p3, %p1644_p0 }
 0x4b7   :  { %v1604_v59 = vpop.permute.xlu1 %1603 }
 0x4b8   :  { %v1606_v34 = vunpack.i.h.bf16 %v1604_v59  ;;  %v1605_v0 = vunpack.i.l.bf16 %v1604_v59 }
 0x4ba   :  { %v1469_v50 = vpack.c.bf16 %v1606_v34, %v1605_v0 }
 0x4bb   :  { %v1609_v30 = vpop.permute.xlu0 %1608 }
 0x4bc   :  { %v1611_v25 = vunpack.i.h.bf16 %v1609_v30  ;;  %v1610_v15 = vunpack.i.l.bf16 %v1609_v30  ;;  %1471 = vmatpush1.bf16.msk.msra.mxu0 %vm1832_vm8, %v1469_v50 }
 0x4bd   :  { %1472 = vmatprep.subr.bf16.mxu0 %v1671_v45 }
 0x4be   :  { %v1473_v24 = vpack.c.bf16 %v1611_v25, %v1610_v15 }
 0x4bf   :  { %v1614_v16 = vpop.permute.xlu1 %1613 }
 0x4c0   :  { %v1616_v18 = vunpack.i.h.bf16 %v1614_v16  ;;  %v1615_v33 = vunpack.i.l.bf16 %v1614_v16  ;;  %1475 = vmatpush1.bf16.msk.msra.mxu0 %vm1832_vm8, %v1473_v24 }
 0x4c1   :  { %1476 = vmatprep.subr.bf16.mxu0 %v1671_v45 }
 0x4c2   :  { %v1477_v14 = vpack.c.bf16 %v1616_v18, %v1615_v33 }
 0x4c3   :  { %v1619_v32 = vpop.permute.xlu0 %1618  ;;  %v1624_v54 = vpop.permute.xlu1 %1623 }
 0x4c4   :  { %v1621_v52 = vunpack.i.h.bf16 %v1619_v32  ;;  %v1620_v53 = vunpack.i.l.bf16 %v1619_v32  ;;  %1479 = vmatpush1.bf16.msk.msra.mxu0 %vm1832_vm8, %v1477_v14  ;;  %v1626_v57 = vunpack.i.h.bf16 %v1624_v54  ;;  %v1625_v58 = vunpack.i.l.bf16 %v1624_v54 }
 0x4c5   :  { %1480 = vmatprep.subr.bf16.mxu0 %v1671_v45 }
 0x4c6   :  { %v1481_v17 = vpack.c.bf16 %v1621_v52, %v1620_v53  ;;  %v1497_v55 = vpack.c.bf16 %v1626_v57, %v1625_v58 }
 0x4c7   :  { %v1629_v29 = vpop.permute.xlu0 %1628  ;;  %v1634_v62 = vpop.permute.xlu1 %1633 }
 0x4c8   :  { %1483 = vmatpush1.bf16.msk.msra.mxu0 %vm1832_vm8, %v1481_v17  ;;  %v1631_v60 = vunpack.i.h.bf16 %v1629_v29  ;;  %v1630_v61 = vunpack.i.l.bf16 %v1629_v29  ;;  %v1636_v1 = vunpack.i.h.bf16 %v1634_v62  ;;  %v1635_v63 = vunpack.i.l.bf16 %v1634_v62 }
 0x4c9   :  { %1484 = vmatprep.subr.bf16.mxu0 %v1671_v45 }
 0x4ca   :  { %v1501_v2 = vpack.c.bf16 %v1631_v60, %v1630_v61  ;;  %v1505_v5 = vpack.c.bf16 %v1636_v1, %v1635_v63 }
 0x4cb   :  { %v1639_v4 = vpop.permute.xlu0 %1638 }
 0x4cc   :  { %1486 = vmatpush1.bf16.msra.mxu0 %v1485_v11  ;;  %v1641_v6 = vunpack.i.h.bf16 %v1639_v4  ;;  %v1640_v7 = vunpack.i.l.bf16 %v1639_v4 }
 0x4cd   :  { %1487 = vmatprep.subr.bf16.mxu0 %v1671_v45 }
 0x4ce   :  { %v1509_v8 = vpack.c.bf16 %v1641_v6, %v1640_v7 }
 0x4d0   :  { %1489 = vmatpush1.bf16.msra.mxu0 %v1488_v21 }
 0x4d1   :  { %1490 = vmatprep.subr.bf16.mxu0 %v1671_v45 }
 0x4d4   :  { %1492 = vmatpush1.bf16.msra.mxu0 %v1491_v56 }
 0x4d5   :  { %1493 = vmatprep.subr.bf16.mxu0 %v1671_v45 }
 0x4d8   :  { %1495 = vmatpush1.bf16.msra.mxu0 %v1494_v23  ;;  %v585_v20 = vpop.permute.xlu1 %584 }
 0x4d9   :  { %1496 = vmatprep.subr.bf16.mxu0 %v1671_v45 }
 0x4dc   :  { %1499 = vmatpush1.bf16.msk.msra.mxu0 %vm1846_vm9, %v1497_v55 }
 0x4dd   :  { %1500 = vmatprep.subr.bf16.mxu0 %v1671_v45 }
 0x4e0   :  { %1503 = vmatpush1.bf16.msk.msra.mxu0 %vm1846_vm9, %v1501_v2 }
 0x4e1   :  { %1504 = vmatprep.subr.bf16.mxu0 %v1671_v45 }
 0x4e4   :  { %1507 = vmatpush1.bf16.msk.msra.mxu0 %vm1846_vm9, %v1505_v5 }
 0x4e5   :  { %1508 = vmatprep.subr.bf16.mxu0 %v1671_v45 }
 0x4e8   :  { %1511 = vmatpush1.bf16.msk.msra.mxu0 %vm1846_vm9, %v1509_v8 }
 0x4eb   :  { %1080 = vmatmul.mubr.f32.vlgmr.msra.gmra.mrb[2].mxu0 %v2099_v19 }
 0x4f4   :  { %v658_v9 = vpop.f32.mrb[0].mxu0 }
 0x4f5   :  { %v659_v43 = vadd.f32 %v658_v9, %v585_v20  ;;  %v660_v10 = vpop.f32.mrb[1].mxu0 }
 0x4f7   :  { %663 = vst.msk [vmem:[#allocation2] sm:$0xf] %vm662_vm11, %v659_v43 }
 0x5be   :  { %v1081_v11 = vpop.f32.mrb[2].mxu0 }
 0x5bf   :  { %v1082_v40 = vadd.f32 %v1081_v11, %v585_v20  ;;  %v1083_v49 = vpop.f32.mrb[3].mxu0 }
 0x5c1   :  { %1086 = vst.msk [vmem:[#allocation2 + $0x4] sm:$0xf] %vm662_vm11, %v1082_v40 }
 0x5c2   :  { %1654 = shalt.err (!%p1651_p4)
}
 0x5c3   :  { %s1655_s19 = scalar_lea.hbm %s2211_s9, 128 }
 0x5c4   :  { %p1656_p5 = scmp.ne.s32.totalorder %s2211_s9, %s1655_s19  ;;  %p1659_p6 = scmp.lt.u32.totalorder %s1655_s19, %s2211_s9 }
 0x5c6   :  { %p1661_p7 = pnand %p1659_p6, %p1656_p5 }
 0x5c8   :  { %1664 = shalt.err (!%p1661_p7)
}
 0x5c9   :  { %s1673_s24 = smov 64   ;;  %s1674_s25 = smov 4  }
 0x5ca   :  { %1098 = dma.vmem_to_hbm [thread:$0]  %s1093_s11, 128, %s2211_s9, [#allocation3], %s1673_s24, %s1673_s24, %s1674_s25  }
 0x5cb   :  { %1665 = dma.done.wait [#allocation3], 128  }
 0x5cc   :  { %1666 = vsyncadd [#allocation3], 4294967168 }
 0x5cd   :  { %1102 = vsyncpa [#allocation3], 1 }

</bundles_post_ra>
